<compile_context>
chip_gen: v6e
topology: v6e:2x2x1
jax: 0.10.0
libtpu: 0.0.40
codegen_flags: <defaults>
</compile_context>

<pallas_src>
import jax
import jax.numpy as jnp
from jax.experimental import pallas as pl
from jax.experimental.pallas import tpu as pltpu

LANE = 128


def _round_up(v, m):
    return ((v + m - 1) // m) * m


def _mlp_kernel(x_ref, *refs):
    """refs = (w0, b0, w1, b1, ..., wL, bL, out_ref).

    x/out are batch tiles pipelined over the grid; weights/biases have constant
    index_maps so they are fetched once and stay resident in VMEM.
    """
    out_ref = refs[-1]
    param_refs = refs[:-1]
    n_layers = len(param_refs) // 2

    h = x_ref[...].astype(jnp.float32)
    for i in range(n_layers):
        w = param_refs[2 * i][...]          # bf16 [in_pad, out_pad]
        b = param_refs[2 * i + 1][...]      # f32  [1, out_pad]
        # nn.Linear: y = x @ W^T + b  (W pre-transposed to [in, out]).
        # bf16 MXU inputs, f32 accumulation; bias add stays f32 on the VPU.
        h = jnp.dot(h.astype(w.dtype), w, preferred_element_type=jnp.float32) + b
        # use_activation=False (module default) -> no nonlinearity between layers.
        # Dropout(0.2/0.2/0.1/0.0) -> identity at inference (eval mode).
    out_ref[...] = h.astype(out_ref.dtype)


def _pad_params(params, param_dtype):
    """Zero-pad every Linear to lane-dense [in_pad, out_pad] (multiples of 128)."""
    padded = []
    for w, b in params:
        k, n = w.shape
        kp, npad = _round_up(k, LANE), _round_up(n, LANE)
        wp = jnp.zeros((kp, npad), param_dtype).at[:k, :n].set(w.astype(param_dtype))
        bp = jnp.zeros((1, npad), jnp.float32).at[:, :n].set(b.astype(jnp.float32))
        padded.append((wp, bp))
    return padded


def classifier_forward(x, params, *, block_batch=256, param_dtype=jnp.bfloat16):
    """params: list of (W [in,out], b [1,out]) per Linear layer, in order."""
    batch, in_features = x.shape
    out_features = params[-1][0].shape[1]

    padded_params = _pad_params(params, param_dtype)
    in_pad = padded_params[0][0].shape[0]
    out_pad = padded_params[-1][0].shape[1]

    # Batch tile: sublane-aligned, MXU-friendly, capped at 256 rows.
    tb = min(block_batch, _round_up(batch, 8))
    padded_batch = _round_up(batch, tb)
    grid = (padded_batch // tb,)

    # Zero-pad x to [padded_batch, in_pad]; padded rows/cols hit zero weights.
    x_p = jnp.zeros((padded_batch, in_pad), x.dtype).at[:batch, :in_features].set(x)

    flat = []
    in_specs = [pl.BlockSpec((tb, in_pad), lambda i: (i, 0))]
    for w, b in padded_params:
        flat.append(w)
        flat.append(b)
        in_specs.append(pl.BlockSpec(w.shape, lambda i: (0, 0)))   # resident
        in_specs.append(pl.BlockSpec(b.shape, lambda i: (0, 0)))   # resident
    out_specs = pl.BlockSpec((tb, out_pad), lambda i: (i, 0))

    # VMEM budget: resident params + double-buffered x/out tiles + activations.
    param_bytes = sum(int(a.nbytes) for a in flat)
    widest = max(w.shape[1] for w, _ in padded_params)
    io_bytes = 2 * tb * in_pad * x_p.dtype.itemsize + 2 * tb * out_pad * 4
    act_bytes = 4 * tb * widest * 4
    vmem_limit = int(min(param_bytes + io_bytes + act_bytes + (8 << 20),
                         100 * 1024 * 1024))

    flops = 2 * padded_batch * sum(w.shape[0] * w.shape[1] for w, _ in padded_params)
    bytes_accessed = int(x_p.nbytes) + param_bytes + padded_batch * out_pad * 4

    out = pl.pallas_call(
        _mlp_kernel,
        out_shape=jax.ShapeDtypeStruct((padded_batch, out_pad), jnp.float32),
        grid=grid,
        in_specs=in_specs,
        out_specs=out_specs,
        compiler_params=pltpu.CompilerParams(
            dimension_semantics=("parallel",),
            vmem_limit_bytes=vmem_limit),
        cost_estimate=pl.CostEstimate(
            flops=flops, transcendentals=0, bytes_accessed=bytes_accessed),
    )(x_p, *flat)

    # Slice padded batch rows and lane-padded output columns back off.
    return out[:batch, :out_features]


def init_classifier_params(key, input_size, hidden_sizes, output_size):
    """Deterministic init mimicking PyTorch nn.Linear (uniform +/- 1/sqrt(fan_in))."""
    sizes = [input_size] + list(hidden_sizes) + [output_size]
    params = []
    for i in range(len(sizes) - 1):
        fan_in, fan_out = sizes[i], sizes[i + 1]
        key, kw, kb = jax.random.split(key, 3)
        bound = 1.0 / (fan_in ** 0.5)
        w = jax.random.uniform(kw, (fan_in, fan_out), jnp.float32, -bound, bound)
        b = jax.random.uniform(kb, (1, fan_out), jnp.float32, -bound, bound)
        params.append((w, b))
    return params


def classifier_reference(x, params, param_dtype=jnp.bfloat16):
    """Pure-JAX reference of the same forward pass (same bf16-in / f32-acc recipe)."""
    h = x.astype(jnp.float32)
    for w, b in params:
        h = jnp.dot(h.astype(param_dtype), w.astype(param_dtype),
                    preferred_element_type=jnp.float32) + b.astype(jnp.float32)
    return h


if __name__ == "__main__":
    # Small shapes consistent with the module (input_size -> hidden stack -> 1).
    batch = 8
    input_size = 32
    hidden_sizes = [64, 32, 16, 8]   # scaled-down analogue of default [1024,128,64,16]
    output_size = 1

    key = jax.random.PRNGKey(0)
    key, kx = jax.random.split(key)
    x = jax.random.normal(kx, (batch, input_size), dtype=jnp.float32)

    params = init_classifier_params(key, input_size, hidden_sizes, output_size)

    out = classifier_forward(x, params)
    out = jax.block_until_ready(out)

    ref = classifier_reference(x, params)
    assert out.shape == (batch, output_size)
    assert jnp.allclose(out, ref, atol=1e-2, rtol=1e-2), (out, ref)

    print("KERNEL_OK")
</pallas_src>

<mosaic_0001>
module attributes {stable_mosaic.version = 11 : i64} {
  func.func @_mlp_kernel(%arg0: i32, %arg1: memref<8x128xf32, #tpu.memory_space<vmem>>, %arg2: memref<128x128xbf16, #tpu.memory_space<vmem>>, %arg3: memref<1x128xf32, #tpu.memory_space<vmem>>, %arg4: memref<128x128xbf16, #tpu.memory_space<vmem>>, %arg5: memref<1x128xf32, #tpu.memory_space<vmem>>, %arg6: memref<128x128xbf16, #tpu.memory_space<vmem>>, %arg7: memref<1x128xf32, #tpu.memory_space<vmem>>, %arg8: memref<128x128xbf16, #tpu.memory_space<vmem>>, %arg9: memref<1x128xf32, #tpu.memory_space<vmem>>, %arg10: memref<128x128xbf16, #tpu.memory_space<vmem>>, %arg11: memref<1x128xf32, #tpu.memory_space<vmem>>, %arg12: memref<8x128xf32, #tpu.memory_space<vmem>>) attributes {dimension_semantics = [#tpu.dimension_semantics<parallel>], iteration_bounds = array<i64: 1>, scalar_prefetch = 0 : i64, scratch_operands = 0 : i64, tpu.core_type = #tpu.core_type<tc>, window_params = [{transform_indices = @transform_0, window_bounds = array<i64: 8, 128>}, {pipeline_mode = #tpu.pipeline_mode<synchronous>, transform_indices = @transform_1, window_bounds = array<i64: 128, 128>}, {pipeline_mode = #tpu.pipeline_mode<synchronous>, transform_indices = @transform_2, window_bounds = array<i64: 1, 128>}, {pipeline_mode = #tpu.pipeline_mode<synchronous>, transform_indices = @transform_3, window_bounds = array<i64: 128, 128>}, {pipeline_mode = #tpu.pipeline_mode<synchronous>, transform_indices = @transform_4, window_bounds = array<i64: 1, 128>}, {pipeline_mode = #tpu.pipeline_mode<synchronous>, transform_indices = @transform_5, window_bounds = array<i64: 128, 128>}, {pipeline_mode = #tpu.pipeline_mode<synchronous>, transform_indices = @transform_6, window_bounds = array<i64: 1, 128>}, {pipeline_mode = #tpu.pipeline_mode<synchronous>, transform_indices = @transform_7, window_bounds = array<i64: 128, 128>}, {pipeline_mode = #tpu.pipeline_mode<synchronous>, transform_indices = @transform_8, window_bounds = array<i64: 1, 128>}, {pipeline_mode = #tpu.pipeline_mode<synchronous>, transform_indices = @transform_9, window_bounds = array<i64: 128, 128>}, {pipeline_mode = #tpu.pipeline_mode<synchronous>, transform_indices = @transform_10, window_bounds = array<i64: 1, 128>}, {transform_indices = @transform_11, window_bounds = array<i64: 8, 128>}]} {
    %c0 = arith.constant 0 : index
    %c0_0 = arith.constant 0 : index
    %0 = vector.load %arg1[%c0, %c0_0] : memref<8x128xf32, #tpu.memory_space<vmem>>, vector<8x128xf32>
    %c0_1 = arith.constant 0 : index
    %c0_2 = arith.constant 0 : index
    %1 = vector.load %arg2[%c0_1, %c0_2] : memref<128x128xbf16, #tpu.memory_space<vmem>>, vector<128x128xbf16>
    %c0_3 = arith.constant 0 : index
    %c0_4 = arith.constant 0 : index
    %2 = vector.load %arg3[%c0_3, %c0_4] : memref<1x128xf32, #tpu.memory_space<vmem>>, vector<1x128xf32>
    %3 = arith.truncf %0 : vector<8x128xf32> to vector<8x128xbf16>
    %cst = arith.constant dense<0.000000e+00> : vector<8x128xf32>
    %4 = tpu.matmul %3, %1, %cst {dimension_numbers = #tpu.dot_dimension_numbers<[1], [0], [0], [1], [0, 0, 1, 1], [], []>} : vector<8x128xbf16>, vector<128x128xbf16>, vector<8x128xf32> -> vector<8x128xf32>
    %5 = vector.broadcast %2 : vector<1x128xf32> to vector<8x128xf32>
    %6 = arith.addf %4, %5 : vector<8x128xf32>
    %c0_5 = arith.constant 0 : index
    %c0_6 = arith.constant 0 : index
    %7 = vector.load %arg4[%c0_5, %c0_6] : memref<128x128xbf16, #tpu.memory_space<vmem>>, vector<128x128xbf16>
    %c0_7 = arith.constant 0 : index
    %c0_8 = arith.constant 0 : index
    %8 = vector.load %arg5[%c0_7, %c0_8] : memref<1x128xf32, #tpu.memory_space<vmem>>, vector<1x128xf32>
    %9 = arith.truncf %6 : vector<8x128xf32> to vector<8x128xbf16>
    %cst_9 = arith.constant dense<0.000000e+00> : vector<8x128xf32>
    %10 = tpu.matmul %9, %7, %cst_9 {dimension_numbers = #tpu.dot_dimension_numbers<[1], [0], [0], [1], [0, 0, 1, 1], [], []>} : vector<8x128xbf16>, vector<128x128xbf16>, vector<8x128xf32> -> vector<8x128xf32>
    %11 = vector.broadcast %8 : vector<1x128xf32> to vector<8x128xf32>
    %12 = arith.addf %10, %11 : vector<8x128xf32>
    %c0_10 = arith.constant 0 : index
    %c0_11 = arith.constant 0 : index
    %13 = vector.load %arg6[%c0_10, %c0_11] : memref<128x128xbf16, #tpu.memory_space<vmem>>, vector<128x128xbf16>
    %c0_12 = arith.constant 0 : index
    %c0_13 = arith.constant 0 : index
    %14 = vector.load %arg7[%c0_12, %c0_13] : memref<1x128xf32, #tpu.memory_space<vmem>>, vector<1x128xf32>
    %15 = arith.truncf %12 : vector<8x128xf32> to vector<8x128xbf16>
    %cst_14 = arith.constant dense<0.000000e+00> : vector<8x128xf32>
    %16 = tpu.matmul %15, %13, %cst_14 {dimension_numbers = #tpu.dot_dimension_numbers<[1], [0], [0], [1], [0, 0, 1, 1], [], []>} : vector<8x128xbf16>, vector<128x128xbf16>, vector<8x128xf32> -> vector<8x128xf32>
    %17 = vector.broadcast %14 : vector<1x128xf32> to vector<8x128xf32>
    %18 = arith.addf %16, %17 : vector<8x128xf32>
    %c0_15 = arith.constant 0 : index
    %c0_16 = arith.constant 0 : index
    %19 = vector.load %arg8[%c0_15, %c0_16] : memref<128x128xbf16, #tpu.memory_space<vmem>>, vector<128x128xbf16>
    %c0_17 = arith.constant 0 : index
    %c0_18 = arith.constant 0 : index
    %20 = vector.load %arg9[%c0_17, %c0_18] : memref<1x128xf32, #tpu.memory_space<vmem>>, vector<1x128xf32>
    %21 = arith.truncf %18 : vector<8x128xf32> to vector<8x128xbf16>
    %cst_19 = arith.constant dense<0.000000e+00> : vector<8x128xf32>
    %22 = tpu.matmul %21, %19, %cst_19 {dimension_numbers = #tpu.dot_dimension_numbers<[1], [0], [0], [1], [0, 0, 1, 1], [], []>} : vector<8x128xbf16>, vector<128x128xbf16>, vector<8x128xf32> -> vector<8x128xf32>
    %23 = vector.broadcast %20 : vector<1x128xf32> to vector<8x128xf32>
    %24 = arith.addf %22, %23 : vector<8x128xf32>
    %c0_20 = arith.constant 0 : index
    %c0_21 = arith.constant 0 : index
    %25 = vector.load %arg10[%c0_20, %c0_21] : memref<128x128xbf16, #tpu.memory_space<vmem>>, vector<128x128xbf16>
    %c0_22 = arith.constant 0 : index
    %c0_23 = arith.constant 0 : index
    %26 = vector.load %arg11[%c0_22, %c0_23] : memref<1x128xf32, #tpu.memory_space<vmem>>, vector<1x128xf32>
    %27 = arith.truncf %24 : vector<8x128xf32> to vector<8x128xbf16>
    %cst_24 = arith.constant dense<0.000000e+00> : vector<8x128xf32>
    %28 = tpu.matmul %27, %25, %cst_24 {dimension_numbers = #tpu.dot_dimension_numbers<[1], [0], [0], [1], [0, 0, 1, 1], [], []>} : vector<8x128xbf16>, vector<128x128xbf16>, vector<8x128xf32> -> vector<8x128xf32>
    %29 = vector.broadcast %26 : vector<1x128xf32> to vector<8x128xf32>
    %30 = arith.addf %28, %29 : vector<8x128xf32>
    %c0_25 = arith.constant 0 : index
    %c0_26 = arith.constant 0 : index
    %31 = vector.load %arg12[%c0_25, %c0_26] : memref<8x128xf32, #tpu.memory_space<vmem>>, vector<8x128xf32>
    tpu.vector_store %arg12[%c0_25, %c0_26], %30 {strides = array<i32>} : memref<8x128xf32, #tpu.memory_space<vmem>>, vector<8x128xf32>,
    return
  }
  func.func @transform_0(%arg0: i32) -> (i32, i32) {
    %c0_i32 = arith.constant 0 : i32
    %c0_i32_0 = arith.constant 0 : i32
    return %arg0, %c0_i32 : i32, i32
  }
  func.func @transform_1(%arg0: i32) -> (i32, i32) {
    %c0_i32 = arith.constant 0 : i32
    %c0_i32_0 = arith.constant 0 : i32
    %c0_i32_1 = arith.constant 0 : i32
    return %c0_i32, %c0_i32_0 : i32, i32
  }
  func.func @transform_2(%arg0: i32) -> (i32, i32) {
    %c0_i32 = arith.constant 0 : i32
    %c0_i32_0 = arith.constant 0 : i32
    %c0_i32_1 = arith.constant 0 : i32
    return %c0_i32, %c0_i32_0 : i32, i32
  }
  func.func @transform_3(%arg0: i32) -> (i32, i32) {
    %c0_i32 = arith.constant 0 : i32
    %c0_i32_0 = arith.constant 0 : i32
    %c0_i32_1 = arith.constant 0 : i32
    return %c0_i32, %c0_i32_0 : i32, i32
  }
  func.func @transform_4(%arg0: i32) -> (i32, i32) {
    %c0_i32 = arith.constant 0 : i32
    %c0_i32_0 = arith.constant 0 : i32
    %c0_i32_1 = arith.constant 0 : i32
    return %c0_i32, %c0_i32_0 : i32, i32
  }
  func.func @transform_5(%arg0: i32) -> (i32, i32) {
    %c0_i32 = arith.constant 0 : i32
    %c0_i32_0 = arith.constant 0 : i32
    %c0_i32_1 = arith.constant 0 : i32
    return %c0_i32, %c0_i32_0 : i32, i32
  }
  func.func @transform_6(%arg0: i32) -> (i32, i32) {
    %c0_i32 = arith.constant 0 : i32
    %c0_i32_0 = arith.constant 0 : i32
    %c0_i32_1 = arith.constant 0 : i32
    return %c0_i32, %c0_i32_0 : i32, i32
  }
  func.func @transform_7(%arg0: i32) -> (i32, i32) {
    %c0_i32 = arith.constant 0 : i32
    %c0_i32_0 = arith.constant 0 : i32
    %c0_i32_1 = arith.constant 0 : i32
    return %c0_i32, %c0_i32_0 : i32, i32
  }
  func.func @transform_8(%arg0: i32) -> (i32, i32) {
    %c0_i32 = arith.constant 0 : i32
    %c0_i32_0 = arith.constant 0 : i32
    %c0_i32_1 = arith.constant 0 : i32
    return %c0_i32, %c0_i32_0 : i32, i32
  }
  func.func @transform_9(%arg0: i32) -> (i32, i32) {
    %c0_i32 = arith.constant 0 : i32
    %c0_i32_0 = arith.constant 0 : i32
    %c0_i32_1 = arith.constant 0 : i32
    return %c0_i32, %c0_i32_0 : i32, i32
  }
  func.func @transform_10(%arg0: i32) -> (i32, i32) {
    %c0_i32 = arith.constant 0 : i32
    %c0_i32_0 = arith.constant 0 : i32
    %c0_i32_1 = arith.constant 0 : i32
    return %c0_i32, %c0_i32_0 : i32, i32
  }
  func.func @transform_11(%arg0: i32) -> (i32, i32) {
    %c0_i32 = arith.constant 0 : i32
    %c0_i32_0 = arith.constant 0 : i32
    return %arg0, %c0_i32 : i32, i32
  }
}

</mosaic_0001>

<bundles_post_ra>
// kernel: tpu_custom_call.1
= control target key start
LH: loop header
LB: loop body
LE: loop exit
PB: predicated region body
PF: predicated region fallthrough
CT: control target
= control target key end

     0   :  { %16 = vsyncpa [#allocation3], 0  ;;  %s1263_s0 = inlined_call_operand.hbm [shape: f32[8,128], index: 0, kind: input, shape index: {}]   ;;  %s1264_s1 = inlined_call_operand.hbm [shape: bf16[128,128], index: 1, kind: input, shape index: {}]   ;;  %s1265_s2 = inlined_call_operand.vmem [shape: f32[1,128], index: 2, kind: input, shape index: {}]   ;;  %s1266_s3 = inlined_call_operand.hbm [shape: bf16[128,128], index: 3, kind: input, shape index: {}]   ;;  %s1267_s4 = inlined_call_operand.vmem [shape: f32[1,128], index: 4, kind: input, shape index: {}]   ;;  %s1268_s5 = inlined_call_operand.hbm [shape: bf16[128,128], index: 5, kind: input, shape index: {}]   ;;  %s1269_s6 = inlined_call_operand.vmem [shape: f32[1,128], index: 6, kind: input, shape index: {}]   ;;  %s1270_s7 = inlined_call_operand.hbm [shape: bf16[128,128], index: 7, kind: input, shape index: {}]   ;;  %s1271_s8 = inlined_call_operand.vmem [shape: f32[1,128], index: 8, kind: input, shape index: {}]   ;;  %s1272_s9 = inlined_call_operand.hbm [shape: bf16[128,128], index: 9, kind: input, shape index: {}]   ;;  %s1273_s10 = inlined_call_operand.vmem [shape: f32[1,128], index: 10, kind: input, shape index: {}]   ;;  %s1274_s11 = inlined_call_operand.hbm [shape: f32[8,128], index: 11, kind: output, shape index: {}]  }
   0x1   :  { %17 = vsyncpa [#allocation6], 0 }
   0x2   :  { %18 = vsyncpa [#allocation9], 0 }
   0x3   :  { %19 = vsyncpa [#allocation12], 0 }
   0x4   :  { %20 = vsyncpa [#allocation4], 0  ;;  %s1091_s17 = smov [#allocation5]  }
   0x5   :  { %s36_s18 = sshll.u32 %s1091_s17, 4  ;;  %s37_s18 = int_to_ptr.vmem [resolvable:$true] %s36_s18 }
   0x6   :  { %s949_s19 = scalar_lea.vmem %s37_s18, 1024  ;;  %p954_p1 = scmp.lt.s32.totalorder %s37_s18, %s37_s18 }
   0x7   :  { %p950_p0 = scmp.ne.s32.totalorder %s37_s18, %s949_s19  ;;  %p955_p2 = scmp.lt.s32.totalorder %s949_s19, %s949_s19 }
   0x9   :  { %p956_p3 = por %p955_p2, %p954_p1 }
   0xb   :  { %p957_p4 = pnand %p956_p3, %p950_p0 }
   0xd   :  { %960 = shalt.err (!%p957_p4)
}
   0xe   :  { %s1092_s20 = smov 64   ;;  %s1093_s21 = smov 4  }
   0xf   :  { %42 = dma.hbm_to_vmem [thread:$0]  %s1264_s1, 1024, %s37_s18, [#allocation6], %s1092_s20, %s1092_s20, %s1093_s21  }
  0x10   :  { %s1094_s24 = smov [#allocation8]   ;;  %s1095_s26 = smov [#allocation2]  }
  0x11   :  { %s64_s25 = sshll.u32 %s1094_s24, 4  ;;  %s27_s27 = sshll.u32 %s1095_s26, 4  ;;  %s65_s25 = int_to_ptr.vmem [resolvable:$true] %s64_s25  ;;  %s28_s27 = int_to_ptr.vmem [resolvable:$true] %s27_s27 }
  0x12   :  { %s969_s28 = scalar_lea.vmem %s65_s25, 1024  ;;  %p974_p6 = scmp.lt.s32.totalorder %s65_s25, %s65_s25 }
  0x13   :  { %p970_p5 = scmp.ne.s32.totalorder %s65_s25, %s969_s28  ;;  %p975_p7 = scmp.lt.s32.totalorder %s969_s28, %s969_s28 }
  0x15   :  { %p976_p8 = por %p975_p7, %p974_p6 }
  0x17   :  { %p977_p9 = pnand %p976_p8, %p970_p5 }
  0x19   :  { %980 = shalt.err (!%p977_p9)
}
  0x1a   :  { %70 = dma.hbm_to_vmem [thread:$0]  %s1268_s5, 1024, %s65_s25, [#allocation9], %s1092_s20, %s1092_s20, %s1093_s21  }
  0x1b   :  { %s989_s1 = scalar_lea.vmem %s28_s27, 128  ;;  %p994_p11 = scmp.lt.s32.totalorder %s28_s27, %s28_s27 }
  0x1c   :  { %p990_p10 = scmp.ne.s32.totalorder %s28_s27, %s989_s1  ;;  %p995_p12 = scmp.lt.s32.totalorder %s989_s1, %s989_s1 }
  0x1e   :  { %p996_p13 = por %p995_p12, %p994_p11 }
  0x20   :  { %p997_p0 = pnand %p996_p13, %p990_p10 }
  0x22   :  { %1000 = shalt.err (!%p997_p0)
}
  0x23   :  { %30 = dma.hbm_to_vmem [thread:$0]  %s1263_s0, 128, %s28_s27, [#allocation3]  }
  0x24   :  { %s1096_s14 = smov [#allocation7]   ;;  %s1097_s16 = smov [#allocation10]  }
  0x25   :  { %s50_s15 = sshll.u32 %s1096_s14, 4  ;;  %s78_s17 = sshll.u32 %s1097_s16, 4  ;;  %s51_s15 = int_to_ptr.vmem [resolvable:$true] %s50_s15  ;;  %s79_s17 = int_to_ptr.vmem [resolvable:$true] %s78_s17 }
  0x26   :  { %s1009_s18 = scalar_lea.vmem %s51_s15, 1024  ;;  %p1014_p2 = scmp.lt.s32.totalorder %s51_s15, %s51_s15 }
  0x27   :  { %p1010_p1 = scmp.ne.s32.totalorder %s51_s15, %s1009_s18  ;;  %p1015_p3 = scmp.lt.s32.totalorder %s1009_s18, %s1009_s18 }
  0x29   :  { %p1016_p4 = por %p1015_p3, %p1014_p2 }
  0x2b   :  { %p1017_p5 = pnand %p1016_p4, %p1010_p1 }
  0x2d   :  { %1020 = shalt.err (!%p1017_p5)
}
  0x2e   :  { %56 = dma.hbm_to_vmem [thread:$0]  %s1266_s3, 1024, %s51_s15, [#allocation6], %s1092_s20, %s1092_s20, %s1093_s21  }
  0x2f   :  { %s1029_s0 = scalar_lea.vmem %s79_s17, 1024  ;;  %p1034_p7 = scmp.lt.s32.totalorder %s79_s17, %s79_s17 }
  0x30   :  { %p1030_p6 = scmp.ne.s32.totalorder %s79_s17, %s1029_s0  ;;  %p1035_p8 = scmp.lt.s32.totalorder %s1029_s0, %s1029_s0 }
  0x32   :  { %p1036_p9 = por %p1035_p8, %p1034_p7 }
  0x34   :  { %p1037_p10 = pnand %p1036_p9, %p1030_p6 }
  0x36   :  { %1040 = shalt.err (!%p1037_p10)
}
  0x37   :  { %84 = dma.hbm_to_vmem [thread:$0]  %s1270_s7, 1024, %s79_s17, [#allocation9], %s1092_s20, %s1092_s20, %s1093_s21  }
  0x38   :  { %s1098_s24 = smov [#allocation11]  }
  0x39   :  { %s92_s25 = sshll.u32 %s1098_s24, 4  ;;  %s93_s25 = int_to_ptr.vmem [resolvable:$true] %s92_s25 }
  0x3a   :  { %s1049_s26 = scalar_lea.vmem %s93_s25, 1024  ;;  %p1054_p12 = scmp.lt.s32.totalorder %s93_s25, %s93_s25 }
  0x3b   :  { %p1050_p11 = scmp.ne.s32.totalorder %s93_s25, %s1049_s26  ;;  %p1055_p13 = scmp.lt.s32.totalorder %s1049_s26, %s1049_s26 }
  0x3d   :  { %p1056_p0 = por %p1055_p13, %p1054_p12 }
  0x3f   :  { %p1057_p1 = pnand %p1056_p0, %p1050_p11 }
  0x41   :  { %1060 = shalt.err (!%p1057_p1)
}
  0x42   :  { %98 = dma.hbm_to_vmem [thread:$0]  %s1272_s9, 1024, %s93_s25, [#allocation12], %s1092_s20, %s1092_s20, %s1093_s21  }
  0x43   :  { %1081 = dma.done.wait [#allocation3], 128  }
  0x44   :  { %1082 = vsyncadd [#allocation3], 4294967168 }
  0x45   :  { %1083 = dma.done.wait [#allocation6], 2048  }
  0x46   :  { %1084 = vsyncadd [#allocation6], 4294965248 }
  0x47   :  { %1085 = dma.done.wait [#allocation9], 2048  }
  0x48   :  { %1086 = vsyncadd [#allocation9], 4294965248 }
  0x49   :  { %1087 = dma.done.wait [#allocation12], 1024  }
  0x4a   :  { %1088 = vsyncadd [#allocation12], 4294966272  ;;  %v1099_v0 = vmov 0.0   ;;  %vm1100_vm0 = vmmov 0   ;;  %v901_v1 = vld [vmem:[#allocation5 + $0x38] sm:$0xff]   ;;  %v902_v2 = vld [vmem:[#allocation5 + $0x30] sm:$0xff]  }
  0x4b   :  { %790 = vmatprep.subr.bf16.mxu0 %v1099_v0  ;;  %806 = vmatprep.mubr.msk.bf16.mxu0 %vm1100_vm0, %v1099_v0  ;;  %v903_v3 = vld [vmem:[#allocation5 + $0x28] sm:$0xff]   ;;  %v909_v4 = vld [vmem:[#allocation7 + $0x38] sm:$0xff]   ;;  %v904_v5 = vld [vmem:[#allocation5 + $0x20] sm:$0xff]   ;;  %s1101_s1 = smov [#allocation13]  }
  0x4c   :  { %810 = vmatprep.subr.bf16.mxu1 %v1099_v0  ;;  %826 = vmatprep.mubr.msk.bf16.mxu1 %vm1100_vm0, %v1099_v0  ;;  %v910_v6 = vld [vmem:[#allocation7 + $0x30] sm:$0xff]   ;;  %v905_v7 = vld [vmem:[#allocation5 + $0x18] sm:$0xff]   ;;  %v911_v8 = vld [vmem:[#allocation7 + $0x28] sm:$0xff]   ;;  %s688_s12 = sshll.u32 %s1101_s1, 4  ;;  %s689_s12 = int_to_ptr.vmem [resolvable:$true] %s688_s12 }
  0x4d   :  { %791 = vmatpush3.bf16.msra.mxu0 %v901_v1  ;;  %811 = vmatpush3.bf16.msra.mxu1 %v909_v4  ;;  %v906_v9 = vld [vmem:[#allocation5 + $0x10] sm:$0xff]   ;;  %v912_v10 = vld [vmem:[#allocation7 + $0x20] sm:$0xff]   ;;  %v907_v11 = vld [vmem:[#allocation5 + $0x8] sm:$0xff]   ;;  %p1066_p3 = scmp.lt.s32.totalorder %s689_s12, %s689_s12 }
  0x4e   :  { %792 = vmatprep.subr.bf16.mxu0 %v1099_v0  ;;  %812 = vmatprep.subr.bf16.mxu1 %v1099_v0  ;;  %v913_v12 = vld [vmem:[#allocation7 + $0x18] sm:$0xff]   ;;  %v908_v13 = vld [vmem:[#allocation5] sm:$0xff]   ;;  %v914_v15 = vld [vmem:[#allocation7 + $0x10] sm:$0xff]  }
  0x4f   :  { %v120_v14 = vld [vmem:[#allocation2] sm:$0xff]  ;;  %v915_v17 = vld [vmem:[#allocation7 + $0x8] sm:$0xff]   ;;  %v916_v18 = vld [vmem:[#allocation7] sm:$0xff]  }
  0x50   :  { %v138_v16 = vpack.c.bf16 %v120_v14, %v120_v14  ;;  %v917_v19 = vld [vmem:[#allocation8 + $0x38] sm:$0xff]   ;;  %v918_v20 = vld [vmem:[#allocation8 + $0x30] sm:$0xff]   ;;  %v919_v21 = vld [vmem:[#allocation8 + $0x28] sm:$0xff]  }
  0x51   :  { %793 = vmatpush3.bf16.msra.mxu0 %v902_v2  ;;  %813 = vmatpush3.bf16.msra.mxu1 %v910_v6  ;;  %v920_v22 = vld [vmem:[#allocation8 + $0x20] sm:$0xff]   ;;  %v921_v23 = vld [vmem:[#allocation8 + $0x18] sm:$0xff]   ;;  %v922_v24 = vld [vmem:[#allocation8 + $0x10] sm:$0xff]  }
  0x52   :  { %794 = vmatprep.subr.bf16.mxu0 %v1099_v0  ;;  %814 = vmatprep.subr.bf16.mxu1 %v1099_v0  ;;  %v923_v25 = vld [vmem:[#allocation8 + $0x8] sm:$0xff]   ;;  %v700_v26 = vld [vmem:[%s1265_s2] ss:$0 sm:$0xff]  ;;  %v924_v33 = vld [vmem:[#allocation8] sm:$0xff]  }
  0x53   :  { %v925_v34 = vld [vmem:[#allocation10 + $0x38] sm:$0xff]   ;;  %v926_v35 = vld [vmem:[#allocation10 + $0x30] sm:$0xff]   ;;  %v927_v36 = vld [vmem:[#allocation10 + $0x28] sm:$0xff]  }
  0x54   :  { %v928_v37 = vld [vmem:[#allocation10 + $0x20] sm:$0xff]   ;;  %v929_v38 = vld [vmem:[#allocation10 + $0x18] sm:$0xff]   ;;  %v930_v39 = vld [vmem:[#allocation10 + $0x10] sm:$0xff]  }
  0x55   :  { %795 = vmatpush3.bf16.msra.mxu0 %v903_v3  ;;  %815 = vmatpush3.bf16.msra.mxu1 %v911_v8  ;;  %v931_v40 = vld [vmem:[#allocation10 + $0x8] sm:$0xff]   ;;  %v709_v41 = vld [vmem:[%s1267_s4] ss:$0 sm:$0xff]  ;;  %v932_v48 = vld [vmem:[#allocation10] sm:$0xff]  }
  0x56   :  { %796 = vmatprep.subr.bf16.mxu0 %v1099_v0  ;;  %816 = vmatprep.subr.bf16.mxu1 %v1099_v0  ;;  %v933_v49 = vld [vmem:[#allocation11 + $0x38] sm:$0xff]   ;;  %v934_v50 = vld [vmem:[#allocation11 + $0x30] sm:$0xff]   ;;  %v935_v51 = vld [vmem:[#allocation11 + $0x28] sm:$0xff]  }
  0x57   :  { %v936_v52 = vld [vmem:[#allocation11 + $0x20] sm:$0xff]   ;;  %v937_v53 = vld [vmem:[#allocation11 + $0x18] sm:$0xff]   ;;  %v938_v54 = vld [vmem:[#allocation11 + $0x10] sm:$0xff]  }
  0x58   :  { %v939_v55 = vld [vmem:[#allocation11 + $0x8] sm:$0xff]   ;;  %v718_v56 = vld [vmem:[%s1269_s6] ss:$0 sm:$0xff]  ;;  %v940_v63 = vld [vmem:[#allocation11] sm:$0xff]  }
  0x59   :  { %797 = vmatpush3.bf16.msra.mxu0 %v904_v5  ;;  %817 = vmatpush3.bf16.msra.mxu1 %v912_v10  ;;  %v727_v1 = vld [vmem:[%s1271_s8] ss:$0 sm:$0xff]  ;;  %s1061_s8 = scalar_lea.vmem %s689_s12, 128 }
  0x5a   :  { %798 = vmatprep.subr.bf16.mxu0 %v1099_v0  ;;  %818 = vmatprep.subr.bf16.mxu1 %v1099_v0  ;;  %p1062_p2 = scmp.ne.s32.totalorder %s689_s12, %s1061_s8  ;;  %p1067_p4 = scmp.lt.s32.totalorder %s1061_s8, %s1061_s8 }
  0x5c   :  { %p1068_p5 = por %p1067_p4, %p1066_p3 }
  0x5d   :  { %799 = vmatpush3.bf16.msra.mxu0 %v905_v7  ;;  %819 = vmatpush3.bf16.msra.mxu1 %v913_v12  ;;  %v736_v7 = vld [vmem:[%s1273_s10] ss:$0 sm:$0xff] }
  0x5e   :  { %800 = vmatprep.subr.bf16.mxu0 %v1099_v0  ;;  %820 = vmatprep.subr.bf16.mxu1 %v1099_v0  ;;  %p1069_p6 = pnand %p1068_p5, %p1062_p2 }
  0x61   :  { %801 = vmatpush3.bf16.msra.mxu0 %v906_v9  ;;  %821 = vmatpush3.bf16.msra.mxu1 %v914_v15 }
  0x62   :  { %802 = vmatprep.subr.bf16.mxu0 %v1099_v0  ;;  %822 = vmatprep.subr.bf16.mxu1 %v1099_v0 }
  0x65   :  { %803 = vmatpush3.bf16.msra.mxu0 %v907_v11  ;;  %823 = vmatpush3.bf16.msra.mxu1 %v915_v17 }
  0x66   :  { %804 = vmatprep.subr.bf16.mxu0 %v1099_v0  ;;  %824 = vmatprep.subr.bf16.mxu1 %v1099_v0 }
  0x69   :  { %805 = vmatpush3.bf16.msra.mxu0 %v908_v13  ;;  %825 = vmatpush3.bf16.msra.mxu1 %v916_v18 }
  0x6a   :  { %830 = vmatprep.subr.bf16.mxu0 %v1099_v0  ;;  %850 = vmatprep.subr.bf16.mxu1 %v1099_v0 }
  0x6c   :  { %807 = vmatmul.mubr.bf16.vlgmr.msra.gmra.mxu0 %v138_v16 }
  0x6d   :  { %846 = vmatprep.mubr.msk.bf16.mxu0 %vm1100_vm0, %v1099_v0  ;;  %831 = vmatpush3.bf16.msra.mxu0 %v917_v19 }
  0x6e   :  { %832 = vmatprep.subr.bf16.mxu0 %v1099_v0 }
  0x71   :  { %833 = vmatpush3.bf16.msra.mxu0 %v918_v20 }
  0x72   :  { %834 = vmatprep.subr.bf16.mxu0 %v1099_v0 }
  0x75   :  { %835 = vmatpush3.bf16.msra.mxu0 %v919_v21 }
  0x76   :  { %836 = vmatprep.subr.bf16.mxu0 %v1099_v0 }
  0x79   :  { %837 = vmatpush3.bf16.msra.mxu0 %v920_v22 }
  0x7a   :  { %838 = vmatprep.subr.bf16.mxu0 %v1099_v0 }
  0x7d   :  { %839 = vmatpush3.bf16.msra.mxu0 %v921_v23 }
  0x7e   :  { %840 = vmatprep.subr.bf16.mxu0 %v1099_v0 }
  0x81   :  { %841 = vmatpush3.bf16.msra.mxu0 %v922_v24 }
  0x82   :  { %842 = vmatprep.subr.bf16.mxu0 %v1099_v0 }
  0x85   :  { %843 = vmatpush3.bf16.msra.mxu0 %v923_v25 }
  0x86   :  { %844 = vmatprep.subr.bf16.mxu0 %v1099_v0 }
  0x89   :  { %845 = vmatpush3.bf16.msra.mxu0 %v924_v33 }
  0x8a   :  { %870 = vmatprep.subr.bf16.mxu0 %v1099_v0 }
 0x12c   :  { %v227_v27 = vpop.f32.mrf.mxu0 }
 0x12d   :  { %v228_v28 = vadd.f32 %v700_v26, %v227_v27 }
 0x12e   :  { %v808_v29 = vpop.f32.mrf.mxu0 }
 0x12f   :  { %v250_v30 = vpack.c.bf16 %v228_v28, %v228_v28 }
 0x130   :  { %v230_v31 = vpop.f32.mrf.mxu0 }
 0x131   :  { %827 = vmatmul.mubr.bf16.vlgmr.msra.gmra.mxu1 %v250_v30 }
 0x132   :  { %v809_v32 = vpop.f32.mrf.mxu0  ;;  %866 = vmatprep.mubr.msk.bf16.mxu1 %vm1100_vm0, %v1099_v0  ;;  %851 = vmatpush3.bf16.msra.mxu1 %v925_v34 }
 0x133   :  { %852 = vmatprep.subr.bf16.mxu1 %v1099_v0 }
 0x136   :  { %853 = vmatpush3.bf16.msra.mxu1 %v926_v35 }
 0x137   :  { %854 = vmatprep.subr.bf16.mxu1 %v1099_v0 }
 0x13a   :  { %855 = vmatpush3.bf16.msra.mxu1 %v927_v36 }
 0x13b   :  { %856 = vmatprep.subr.bf16.mxu1 %v1099_v0 }
 0x13e   :  { %857 = vmatpush3.bf16.msra.mxu1 %v928_v37 }
 0x13f   :  { %858 = vmatprep.subr.bf16.mxu1 %v1099_v0 }
 0x142   :  { %859 = vmatpush3.bf16.msra.mxu1 %v929_v38 }
 0x143   :  { %860 = vmatprep.subr.bf16.mxu1 %v1099_v0 }
 0x146   :  { %861 = vmatpush3.bf16.msra.mxu1 %v930_v39 }
 0x147   :  { %862 = vmatprep.subr.bf16.mxu1 %v1099_v0 }
 0x14a   :  { %863 = vmatpush3.bf16.msra.mxu1 %v931_v40 }
 0x14b   :  { %864 = vmatprep.subr.bf16.mxu1 %v1099_v0 }
 0x14e   :  { %865 = vmatpush3.bf16.msra.mxu1 %v932_v48 }
 0x1f1   :  { %v339_v42 = vpop.f32.mrf.mxu1 }
 0x1f2   :  { %v340_v43 = vadd.f32 %v709_v41, %v339_v42 }
 0x1f3   :  { %v828_v44 = vpop.f32.mrf.mxu1 }
 0x1f4   :  { %v362_v45 = vpack.c.bf16 %v340_v43, %v340_v43 }
 0x1f5   :  { %v342_v46 = vpop.f32.mrf.mxu1 }
 0x1f6   :  { %847 = vmatmul.mubr.bf16.vlgmr.msra.gmra.mxu0 %v362_v45 }
 0x1f7   :  { %v829_v47 = vpop.f32.mrf.mxu1  ;;  %886 = vmatprep.mubr.msk.bf16.mxu0 %vm1100_vm0, %v1099_v0  ;;  %871 = vmatpush3.bf16.msra.mxu0 %v933_v49 }
 0x1f8   :  { %872 = vmatprep.subr.bf16.mxu0 %v1099_v0 }
 0x1fb   :  { %873 = vmatpush3.bf16.msra.mxu0 %v934_v50 }
 0x1fc   :  { %874 = vmatprep.subr.bf16.mxu0 %v1099_v0 }
 0x1ff   :  { %875 = vmatpush3.bf16.msra.mxu0 %v935_v51 }
 0x200   :  { %876 = vmatprep.subr.bf16.mxu0 %v1099_v0 }
 0x203   :  { %877 = vmatpush3.bf16.msra.mxu0 %v936_v52 }
 0x204   :  { %878 = vmatprep.subr.bf16.mxu0 %v1099_v0 }
 0x207   :  { %879 = vmatpush3.bf16.msra.mxu0 %v937_v53 }
 0x208   :  { %880 = vmatprep.subr.bf16.mxu0 %v1099_v0 }
 0x20b   :  { %881 = vmatpush3.bf16.msra.mxu0 %v938_v54 }
 0x20c   :  { %882 = vmatprep.subr.bf16.mxu0 %v1099_v0 }
 0x20f   :  { %883 = vmatpush3.bf16.msra.mxu0 %v939_v55 }
 0x210   :  { %884 = vmatprep.subr.bf16.mxu0 %v1099_v0 }
 0x213   :  { %885 = vmatpush3.bf16.msra.mxu0 %v940_v63 }
 0x2b6   :  { %v451_v57 = vpop.f32.mrf.mxu0 }
 0x2b7   :  { %v452_v58 = vadd.f32 %v718_v56, %v451_v57 }
 0x2b8   :  { %v848_v59 = vpop.f32.mrf.mxu0 }
 0x2b9   :  { %v474_v60 = vpack.c.bf16 %v452_v58, %v452_v58 }
 0x2ba   :  { %v454_v61 = vpop.f32.mrf.mxu0 }
 0x2bb   :  { %867 = vmatmul.mubr.bf16.vlgmr.msra.gmra.mxu1 %v474_v60 }
 0x2bc   :  { %v849_v62 = vpop.f32.mrf.mxu0 }
 0x37b   :  { %v563_v2 = vpop.f32.mrf.mxu1 }
 0x37c   :  { %v564_v3 = vadd.f32 %v727_v1, %v563_v2 }
 0x37d   :  { %v868_v0 = vpop.f32.mrf.mxu1 }
 0x37e   :  { %v586_v4 = vpack.c.bf16 %v564_v3, %v564_v3 }
 0x37f   :  { %v566_v5 = vpop.f32.mrf.mxu1 }
 0x380   :  { %887 = vmatmul.mubr.bf16.vlgmr.msra.gmra.mxu0 %v586_v4 }
 0x381   :  { %v869_v6 = vpop.f32.mrf.mxu1 }
 0x440   :  { %v675_v8 = vpop.f32.mrf.mxu0 }
 0x441   :  { %v676_v9 = vadd.f32 %v736_v7, %v675_v8 }
 0x442   :  { %v888_v10 = vpop.f32.mrf.mxu0 }
 0x443   :  { %681 = vst [vmem:[#allocation13] sm:$0xff] %v676_v9 }
 0x444   :  { %v678_v11 = vpop.f32.mrf.mxu0 }
 0x445   :  { %1072 = shalt.err (!%p1069_p6)
}
 0x446   :  { %691 = dma.vmem_to_hbm [thread:$0]  %s689_s12, 128, %s1274_s11, [#allocation4]   ;;  %v889_v12 = vpop.f32.mrf.mxu0 }
 0x447   :  { %1089 = dma.done.wait [#allocation4], 128  }
 0x448   :  { %1090 = vsyncadd [#allocation4], 4294967168 }
 0x449   :  { %695 = vsyncpa [#allocation3], 1 }
 0x44a   :  { %696 = vsyncpa [#allocation6], 1 }
 0x44b   :  { %697 = vsyncpa [#allocation9], 1 }
 0x44c   :  { %698 = vsyncpa [#allocation12], 1 }
 0x44d   :  { %699 = vsyncpa [#allocation4], 1 }

</bundles_post_ra>
